<compile_context>
chip_gen: v6e
topology: v6e:2x2x1
jax: 0.10.0
libtpu: 0.0.40
codegen_flags: <defaults>
</compile_context>

<pallas_src>
import functools

import jax
import jax.numpy as jnp
from jax import lax
from jax.experimental import pallas as pl
from jax.experimental.pallas import tpu as pltpu


# --------------------------------- kernel ----------------------------------

def resblock_kernel(x_ref, wbig_ref, w3_ref, out_ref, *, K, dila, pad, L, C):
    """Fused: (conv_f1, conv_f2) via one im2col matmul (bias/BN folded into the
    weights) + tanh/sigmoid gate + 1x1 conv (bias folded) + tanh + residual,
    on one (C, L) lane-dense batch tile."""
    x = x_ref[...]                                          # (C, L) f32
    lane = lax.broadcasted_iota(jnp.int32, (C, L), 1)       # time index (== lane)

    # im2col: tap k contributes x[:, t + k*dila - pad], zero outside [0, L).
    # Shift via XLU rotate + one boundary mask (no zero-pad / lane-slice /
    # unaligned concat copies).
    taps = []
    for k in range(K):                                      # static unroll (K small)
        s = k * dila - pad
        if s == 0:
            shifted = x
        else:
            shifted = pltpu.roll(x, shift=(-s) % L, axis=1)  # elem t <- x[:, (t+s) % L]
            if s > 0:
                shifted = jnp.where(lane < (L - s), shifted, 0.0)
            else:
                shifted = jnp.where(lane >= (-s), shifted, 0.0)
        taps.append(shifted)

    ones = jnp.ones((1, L), x.dtype)                        # bias row rides on the MXU
    rhs = jnp.concatenate(taps + [ones], axis=0)            # (K*C + 1, L)

    # One MXU push computes BOTH dilated-conv branches; the last weight column
    # is the folded (bias - mean)*scale + beta shift.
    z = jnp.dot(wbig_ref[...], rhs, preferred_element_type=jnp.float32)   # (2C, L)

    x1 = jnp.tanh(z[0:C])                                   # f1 branch
    x2 = 0.5 * (jnp.tanh(0.5 * z[C:2 * C]) + 1.0)           # f2 branch: sigmoid via tanh
    x3 = x1 * x2

    # 1x1 conv (+ folded BN shift via ones row) + tanh + identity residual.
    x3aug = jnp.concatenate([x3, ones], axis=0)             # (C + 1, L)
    z3 = jnp.dot(w3_ref[...], x3aug, preferred_element_type=jnp.float32)  # (C, L)
    out_ref[...] = (jnp.tanh(z3) + x).astype(out_ref.dtype)


# -------------------------------- wrapper -----------------------------------

def resblock_forward(x, kparams, *, size, dila):
    """x: (N, C, L) float32. kparams = (wbig, w3aug) from pack_params."""
    N, C, L = x.shape
    # 'same' padding requires symmetric halo; odd (size-1)*dila would change L.
    assert ((size - 1) * dila) % 2 == 0, "(size-1)*dila must be even for 'same' padding"
    # Keep the (8,128) tile rules happy and the z[0:C]/z[C:2C] slices vreg-aligned.
    assert C % 8 == 0, "C must be a multiple of 8 (sublane alignment)"
    assert L % 128 == 0, "L must be a multiple of 128 (lane alignment)"
    pad = (size - 1) * dila // 2
    wbig, w3aug = kparams

    kern = functools.partial(resblock_kernel, K=size, dila=dila, pad=pad, L=L, C=C)

    return pl.pallas_call(
        kern,
        out_shape=jax.ShapeDtypeStruct((N, C, L), x.dtype),
        grid_spec=pltpu.PrefetchScalarGridSpec(
            num_scalar_prefetch=0,
            grid=(N,),
            in_specs=[
                pl.BlockSpec((pl.Squeezed(), C, L), lambda n: (n, 0, 0)),   # activations
                pl.BlockSpec((2 * C, size * C + 1), lambda n: (0, 0)),      # packed conv weights + shift col
                pl.BlockSpec((C, C + 1), lambda n: (0, 0)),                 # 1x1 conv weight + shift col
            ],
            out_specs=pl.BlockSpec((pl.Squeezed(), C, L), lambda n: (n, 0, 0)),
        ),
        compiler_params=pltpu.CompilerParams(dimension_semantics=("parallel",)),
    )(x, wbig, w3aug)


# ------------------------- parameter construction ---------------------------

def make_branch_params(key, C, K, eps=1e-5):
    """Deterministic Conv1d + BatchNorm1d parameters.

    Returns raw params (for the reference) and (w, scale, shift) where
    scale = gamma / sqrt(var + eps), shift = (bias - mean) * scale + beta.
    """
    k1, k2, k3, k4, k5, k6 = jax.random.split(key, 6)
    w = jax.random.uniform(k1, (C, C, K), jnp.float32, -0.5, 0.5)   # (Cout, Cin, K)
    b = jax.random.uniform(k2, (C,), jnp.float32, -0.5, 0.5)
    gamma = jax.random.uniform(k3, (C,), jnp.float32, 0.5, 1.5)
    beta = jax.random.uniform(k4, (C,), jnp.float32, -0.5, 0.5)
    rmean = jax.random.uniform(k5, (C,), jnp.float32, -0.5, 0.5)
    rvar = jax.random.uniform(k6, (C,), jnp.float32, 0.5, 1.5)
    scale = gamma / jnp.sqrt(rvar + eps)
    shift = (b - rmean) * scale + beta
    raw = (w, b, gamma, beta, rmean, rvar)
    return raw, w, scale, shift


def pack_params(br1, br2, br3, K):
    """Fold BN scales into the conv weights and pack into kernel-ready arrays:
      wbig : (2C, K*C + 1)  rows [f1; f2], cols [tap0 | tap1 | ... | folded shift]
                            (tap columns are Cin-major: col = k*C + cin)
      w3aug: (C, C + 1)     scale-folded 1x1 conv with folded shift as last col
    """
    (w1, s1, h1), (w2, s2, h2), (w3, s3, h3) = br1, br2, br3
    C = w1.shape[0]
    w1f = w1 * s1[:, None, None]                     # fold BN scale per output row
    w2f = w2 * s2[:, None, None]
    wbig = jnp.concatenate([
        w1f.transpose(0, 2, 1).reshape(C, K * C),    # col index = k*C + cin
        w2f.transpose(0, 2, 1).reshape(C, K * C),
    ], axis=0)                                       # (2C, K*C)
    wbig = jnp.concatenate(
        [wbig, jnp.concatenate([h1, h2]).reshape(2 * C, 1)], axis=1)   # (2C, K*C+1)
    w3m = w3[:, :, 0] * s3[:, None]                  # (C, C)
    w3aug = jnp.concatenate([w3m, h3.reshape(C, 1)], axis=1)           # (C, C+1)
    return wbig, w3aug


# -------------------------------- reference ---------------------------------

def ref_conv1d(x, w_oik, b, dila, pad):
    out = lax.conv_general_dilated(
        x, w_oik, window_strides=(1,), padding=[(pad, pad)],
        rhs_dilation=(dila,), dimension_numbers=('NCH', 'OIH', 'NCH'))
    return out + b[None, :, None]


def ref_bn(y, gamma, beta, rmean, rvar, eps=1e-5):
    inv = gamma / jnp.sqrt(rvar + eps)
    return (y - rmean[None, :, None]) * inv[None, :, None] + beta[None, :, None]


def ref_resblock(x, p1, p2, p3, size, dila):
    pad = (size - 1) * dila // 2
    w1, b1, g1, be1, m1, v1 = p1
    w2, b2, g2, be2, m2, v2 = p2
    w3, b3, g3, be3, m3, v3 = p3
    x1 = jnp.tanh(ref_bn(ref_conv1d(x, w1, b1, dila, pad), g1, be1, m1, v1))
    x2 = jax.nn.sigmoid(ref_bn(ref_conv1d(x, w2, b2, dila, pad), g2, be2, m2, v2))
    x3 = x1 * x2
    out = jnp.tanh(ref_bn(ref_conv1d(x3, w3, b3, 1, 0), g3, be3, m3, v3))
    return out + x


# ---------------------------------- main -------------------------------------

if __name__ == "__main__":
    # ResBlock(size=3, dila=2, dim=8) on input (N=2, C=8, L=128)
    size, dila, dim = 3, 2, 8
    N, L = 2, 128

    key = jax.random.PRNGKey(0)
    kx, k1, k2, k3 = jax.random.split(key, 4)
    x = jax.random.normal(kx, (N, dim, L), jnp.float32)

    raw1, w1, s1, h1 = make_branch_params(k1, dim, size)
    raw2, w2, s2, h2 = make_branch_params(k2, dim, size)
    raw3, w3, s3, h3 = make_branch_params(k3, dim, 1)

    kparams = pack_params((w1, s1, h1), (w2, s2, h2), (w3, s3, h3), size)

    out = resblock_forward(x, kparams, size=size, dila=dila)
    out = jax.block_until_ready(out)

    ref = ref_resblock(x, raw1, raw2, raw3, size, dila)
    ref = jax.block_until_ready(ref)

    assert out.shape == (N, dim, L)
    if not jnp.allclose(out, ref, rtol=1e-4, atol=1e-4):
        max_err = float(jnp.max(jnp.abs(out - ref)))
        raise AssertionError(f"mismatch vs reference, max abs err = {max_err}")

    print("KERNEL_OK")
</pallas_src>

<mosaic_0001>
module attributes {stable_mosaic.version = 11 : i64} {
  func.func @resblock_kernel(%arg0: i32, %arg1: memref<1x8x128xf32, #tpu.memory_space<vmem>>, %arg2: memref<16x25xf32, #tpu.memory_space<vmem>>, %arg3: memref<8x9xf32, #tpu.memory_space<vmem>>, %arg4: memref<1x8x128xf32, #tpu.memory_space<vmem>>) attributes {dimension_semantics = [#tpu.dimension_semantics<parallel>], iteration_bounds = array<i64: 2>, scalar_prefetch = 0 : i64, scratch_operands = 0 : i64, tpu.core_type = #tpu.core_type<tc>, window_params = [{transform_indices = @transform_0, window_bounds = array<i64: 1, 8, 128>}, {pipeline_mode = #tpu.pipeline_mode<synchronous>, transform_indices = @transform_1, window_bounds = array<i64: 16, 25>}, {pipeline_mode = #tpu.pipeline_mode<synchronous>, transform_indices = @transform_2, window_bounds = array<i64: 8, 9>}, {transform_indices = @transform_3, window_bounds = array<i64: 1, 8, 128>}]} {
    %c0 = arith.constant 0 : index
    %c0_0 = arith.constant 0 : index
    %c0_1 = arith.constant 0 : index
    %0 = vector.load %arg1[%c0, %c0_0, %c0_1] : memref<1x8x128xf32, #tpu.memory_space<vmem>>, vector<1x8x128xf32>
    %1 = vector.shape_cast %0 : vector<1x8x128xf32> to vector<8x128xf32>
    %2 = tpu.iota {dimensions = array<i32: 1>} : vector<8x128xi32>
    %c2_i32 = arith.constant 2 : i32
    %3 = tpu.dynamic_rotate %1 by %c2_i32 dim 1 : vector<8x128xf32>, i32 -> vector<8x128xf32>
    %c2_i32_2 = arith.constant 2 : i32
    %4 = vector.broadcast %c2_i32_2 : i32 to vector<8x128xi32>
    %5 = arith.cmpi sge, %2, %4 : vector<8x128xi32>
    %cst = arith.constant 0.000000e+00 : f32
    %6 = vector.broadcast %cst : f32 to vector<8x128xf32>
    %7 = arith.select %5, %3, %6 : vector<8x128xi1>, vector<8x128xf32>
    %c126_i32 = arith.constant 126 : i32
    %8 = tpu.dynamic_rotate %1 by %c126_i32 dim 1 : vector<8x128xf32>, i32 -> vector<8x128xf32>
    %c126_i32_3 = arith.constant 126 : i32
    %9 = vector.broadcast %c126_i32_3 : i32 to vector<8x128xi32>
    %10 = arith.cmpi slt, %2, %9 : vector<8x128xi32>
    %cst_4 = arith.constant 0.000000e+00 : f32
    %11 = vector.broadcast %cst_4 : f32 to vector<8x128xf32>
    %12 = arith.select %10, %8, %11 : vector<8x128xi1>, vector<8x128xf32>
    %cst_5 = arith.constant 1.000000e+00 : f32
    %13 = vector.broadcast %cst_5 : f32 to vector<1x128xf32>
    %14 = tpu.concatenate %7, %1, %12, %13 in 0 : vector<8x128xf32>, vector<8x128xf32>, vector<8x128xf32>, vector<1x128xf32> -> vector<25x128xf32>
    %c0_6 = arith.constant 0 : index
    %c0_7 = arith.constant 0 : index
    %15 = vector.load %arg2[%c0_6, %c0_7] : memref<16x25xf32, #tpu.memory_space<vmem>>, vector<16x25xf32>
    %cst_8 = arith.constant dense<0.000000e+00> : vector<16x128xf32>
    %16 = tpu.matmul %15, %14, %cst_8 {dimension_numbers = #tpu.dot_dimension_numbers<[1], [0], [0], [1], [0, 0, 1, 1], [], []>} : vector<16x25xf32>, vector<25x128xf32>, vector<16x128xf32> -> vector<16x128xf32>
    %17 = vector.extract_strided_slice %16 {offsets = [0, 0], sizes = [8, 128], strides = [1, 1]} : vector<16x128xf32> to vector<8x128xf32>
    %18 = math.tanh %17 : vector<8x128xf32>
    %19 = vector.extract_strided_slice %16 {offsets = [8, 0], sizes = [8, 128], strides = [1, 1]} : vector<16x128xf32> to vector<8x128xf32>
    %cst_9 = arith.constant 5.000000e-01 : f32
    %20 = vector.broadcast %cst_9 : f32 to vector<8x128xf32>
    %21 = arith.mulf %20, %19 : vector<8x128xf32>
    %22 = math.tanh %21 : vector<8x128xf32>
    %cst_10 = arith.constant 1.000000e+00 : f32
    %23 = vector.broadcast %cst_10 : f32 to vector<8x128xf32>
    %24 = arith.addf %22, %23 : vector<8x128xf32>
    %cst_11 = arith.constant 5.000000e-01 : f32
    %25 = vector.broadcast %cst_11 : f32 to vector<8x128xf32>
    %26 = arith.mulf %25, %24 : vector<8x128xf32>
    %27 = arith.mulf %18, %26 : vector<8x128xf32>
    %28 = tpu.concatenate %27, %13 in 0 : vector<8x128xf32>, vector<1x128xf32> -> vector<9x128xf32>
    %c0_12 = arith.constant 0 : index
    %c0_13 = arith.constant 0 : index
    %29 = vector.load %arg3[%c0_12, %c0_13] : memref<8x9xf32, #tpu.memory_space<vmem>>, vector<8x9xf32>
    %cst_14 = arith.constant dense<0.000000e+00> : vector<8x128xf32>
    %30 = tpu.matmul %29, %28, %cst_14 {dimension_numbers = #tpu.dot_dimension_numbers<[1], [0], [0], [1], [0, 0, 1, 1], [], []>} : vector<8x9xf32>, vector<9x128xf32>, vector<8x128xf32> -> vector<8x128xf32>
    %31 = math.tanh %30 : vector<8x128xf32>
    %32 = arith.addf %31, %1 : vector<8x128xf32>
    %c0_15 = arith.constant 0 : index
    %c0_16 = arith.constant 0 : index
    %c0_17 = arith.constant 0 : index
    %33 = vector.load %arg4[%c0_15, %c0_16, %c0_17] : memref<1x8x128xf32, #tpu.memory_space<vmem>>, vector<1x8x128xf32>
    %34 = vector.shape_cast %33 : vector<1x8x128xf32> to vector<8x128xf32>
    %35 = vector.shape_cast %32 : vector<8x128xf32> to vector<1x8x128xf32>
    tpu.vector_store %arg4[%c0_15, %c0_16, %c0_17], %35 {strides = array<i32>} : memref<1x8x128xf32, #tpu.memory_space<vmem>>, vector<1x8x128xf32>,
    return
  }
  func.func @transform_0(%arg0: i32) -> (i32, i32, i32) {
    %c0_i32 = arith.constant 0 : i32
    %c0_i32_0 = arith.constant 0 : i32
    %c0_i32_1 = arith.constant 0 : i32
    return %arg0, %c0_i32, %c0_i32_0 : i32, i32, i32
  }
  func.func @transform_1(%arg0: i32) -> (i32, i32) {
    %c0_i32 = arith.constant 0 : i32
    %c0_i32_0 = arith.constant 0 : i32
    %c0_i32_1 = arith.constant 0 : i32
    return %c0_i32, %c0_i32_0 : i32, i32
  }
  func.func @transform_2(%arg0: i32) -> (i32, i32) {
    %c0_i32 = arith.constant 0 : i32
    %c0_i32_0 = arith.constant 0 : i32
    %c0_i32_1 = arith.constant 0 : i32
    return %c0_i32, %c0_i32_0 : i32, i32
  }
  func.func @transform_3(%arg0: i32) -> (i32, i32, i32) {
    %c0_i32 = arith.constant 0 : i32
    %c0_i32_0 = arith.constant 0 : i32
    %c0_i32_1 = arith.constant 0 : i32
    return %arg0, %c0_i32, %c0_i32_0 : i32, i32, i32
  }
}

</mosaic_0001>

<bundles_post_ra>
// kernel: tpu_custom_call.1
= control target key start
LH: loop header
LB: loop body
LE: loop exit
PB: predicated region body
PF: predicated region fallthrough
CT: control target
= control target key end

     0   :  { %8 = vsyncpa [#allocation3], 0  ;;  %s984_s0 = inlined_call_operand.hbm [shape: f32[2,8,128], index: 0, kind: input, shape index: {}]   ;;  %s985_s1 = inlined_call_operand.hbm [shape: f32[16,25], index: 1, kind: input, shape index: {}]   ;;  %s986_s2 = inlined_call_operand.hbm [shape: f32[8,9], index: 2, kind: input, shape index: {}]   ;;  %s987_s3 = inlined_call_operand.hbm [shape: f32[2,8,128], index: 3, kind: output, shape index: {}]  }
   0x1   :  { %10 = vsyncpa [#allocation3 + $0x1], 0 }
   0x2   :  { %11 = vsyncpa [#allocation6], 0 }
   0x3   :  { %12 = vsyncpa [#allocation4], 0 }
   0x4   :  { %14 = vsyncpa [#allocation4 + $0x1], 0  ;;  %s810_s12 = smov 0   ;;  %s812_s13 = smov 0  }
   0x5   :  { %s814_s14 = smov 0   ;;  %s816_s15 = smov 0  }
   0x6 LB: > { %s831_s16 = sadd.s32 4294967295, %s777_s15   ;;  %s499_s17 = sadd.s32 4294967294, %s777_s15   ;;  %s777_s15 = sphi %s816_s15, %s1009_s15   ;;  %s773_s14 = sphi %s814_s14, %s1008_s14   ;;  %s769_s13 = sphi %s812_s13, %s1007_s13   ;;  %s765_s12 = sphi %s810_s12, %s1006_s12  }
   0x7   : > { %p40_p0 = scmp.ne.s32.totalorder %s769_s13, %s765_s12  ;;  %p988_p1 = scmp.eq.s32.totalorder %s831_s16, 0 }
   0x8   : > { %p112_p3 = scmp.eq.s32.totalorder %s499_s17, 1  ;;  %p500_p5 = scmp.ge.s32.totalorder %s777_s15, 1 }
   0x9   : > { %p840_p4 = por %p988_p1, %p40_p0  ;;  %p119_p7 = scmp.lt.s32.totalorder %s777_s15, 3 }
   0xa   : > { %p845_p6 = por %p112_p3, %p40_p0  ;;  %s779_s21 = smov [#allocation5]  }
   0xb   : > { %s992_s18 = scalar_select %p840_p4, 1, 0 }
   0xc   : > { %s993_s19 = scalar_select %p845_p6, 1, 0 }
   0xd   : > { %p850_p8 = pnand %p500_p5, %p119_p7  ;;  %s131_s22 = sshll.u32 %s779_s21, 4  ;;  %s132_s22 = int_to_ptr.vmem [resolvable:$true] %s131_s22 }
   0xe   : > { %s780_s24 = smov [#allocation7]   ;;  %s640_s26 = scalar_lea.vmem %s132_s22, 256 }
   0xf   : > { %s994_s20 = scalar_select %p850_p8, 1, 0 }
  0x10   : > { %p561_p9 = pneg %p850_p8  ;;  %s145_s25 = sshll.u32 %s780_s24, 4  ;;  %s146_s25 = int_to_ptr.vmem [resolvable:$true] %s145_s25 }
  0x11   : > { %p641_p13 = scmp.ne.s32.totalorder %s132_s22, %s640_s26  ;;  %p648_p5 = scmp.lt.s32.totalorder %s132_s22, %s132_s22 }
  0x12   : > { %p859_p11 = pnand %p561_p9, %p988_p1  ;;  %p649_p7 = scmp.lt.s32.totalorder %s640_s26, %s640_s26 }
  0x14   : > { %p631_p12 = pneg %p859_p11  ;;  %p650_p10 = por %p649_p7, %p648_p5 }
  0x16   : > { %p643_p0 = pnand %p641_p13, %p631_p12 }
  0x18   : > { %p644_p3 = pneg %p643_p0 }
  0x1a   : > { %p651_p9 = pnand %p650_p10, %p644_p3 }
  0x1c   : > { %654 = shalt.err (!%p651_p9)
}
  0x1d   : > { %s781_s27 = smov 128   ;;  %s782_s28 = smov 8  }
  0x1e   : > { %564 = dma.hbm_to_vmem [thread:$0]  (!%p859_p11), %s985_s1, 256, %s132_s22, [#allocation6], %s781_s27, %s781_s27, %s782_s28  }
  0x1f   : > { %s666_s4 = scalar_lea.vmem %s146_s25, 128  ;;  %p674_p2 = scmp.lt.s32.totalorder %s146_s25, %s146_s25 }
  0x20   : > { %p667_p1 = scmp.ne.s32.totalorder %s146_s25, %s666_s4  ;;  %p675_p6 = scmp.lt.s32.totalorder %s666_s4, %s666_s4 }
  0x22   : > { %p669_p13 = pnand %p667_p1, %p631_p12  ;;  %p676_p5 = por %p675_p6, %p674_p2 }
  0x24   : > { %p670_p0 = pneg %p669_p13 }
  0x26   : > { %p677_p10 = pnand %p676_p5, %p670_p0 }
  0x28   : > { %680 = shalt.err (!%p677_p10)
}
  0x29   : > { %567 = dma.hbm_to_vmem [thread:$0]  (!%p859_p11), %s986_s2, 128, %s146_s25, [#allocation6]  }
  0x2a   : > { %s882_s7 = sadd.s32 1, %s777_s15   ;;  %s27_s8 = sadd.s32 1, %s773_s14 }
  0x2b   : > { %s24_s9 = ssub.s32 %s777_s15, %s882_s7  ;;  %p34_p1 = scmp.ne.s32.totalorder %s773_s14, %s769_s13 }
  0x2c   : > { %p25_p2 = scmp.eq.s32.totalorder %s24_s9, 0  ;;  %p35_p6 = scmp.eq.s32.totalorder %s777_s15, 0 }
  0x2d   : > { %p996_p12 = scmp.eq.s32.totalorder %s831_s16, 1  ;;  %p578_p7 = scmp.lt.s32.totalorder %s777_s15, 2 }
  0x2e   : > { %s898_s11 = scalar_select %p25_p2, %s773_s14, %s27_s8  }
  0x2f   : > { %p892_p3 = por %p996_p12, %p34_p1  ;;  %p36_p9 = por %p35_p6, %p34_p1 }
  0x30   : > { %s156_s17 = sand.u32 1, %s773_s14   ;;  %s505_s22 = sshll.u32 %s777_s15, 7 }
  0x31   : > { %s997_s10 = scalar_select %p892_p3, 1, 0 }
  0x32   : > { %s504_s21 = sshll.u32 %s156_s17, 3  ;;  %s905_s25 = scalar_lea.hbm %s984_s0, %s505_s22 }
  0x33   : > { %s160_s26 = scalar_lea.vmem [#allocation2], %s504_s21  ;;  %p907_p11 = pnand %p578_p7, %p36_p9 }
  0x34   : > { %s167_s27 = sshll.u32 %s160_s26, 4  ;;  %s157_s29 = scalar_lea.sflag [#allocation3], %s156_s17  ;;  %s168_s27 = int_to_ptr.vmem [resolvable:$true] %s167_s27 }
  0x35   : > { %s681_s30 = scalar_lea.hbm %s905_s25, 128  ;;  %p683_p0 = pneg %p907_p11 }
  0x36   : > { %p682_p13 = scmp.ne.s32.totalorder %s905_s25, %s681_s30  ;;  %s686_s6 = scalar_lea.hbm %s984_s0, 256 }
  0x37   : > { %p687_p1 = scmp.lt.s32.totalorder %s905_s25, %s984_s0  ;;  %p688_p2 = scmp.lt.s32.totalorder %s686_s6, %s681_s30 }
  0x38   : > { %p684_p5 = pnand %p683_p0, %p682_p13 }
  0x39   : > { %p689_p6 = por %p688_p2, %p687_p1 }
  0x3a   : > { %p685_p10 = pneg %p684_p5 }
  0x3c   : > { %p690_p12 = pnand %p689_p6, %p685_p10 }
  0x3e   : > { %693 = shalt.err (!%p690_p12)
}
  0x3f   : > { %s694_s21 = scalar_lea.vmem %s168_s27, 128  ;;  %s783_s17 = smov [#allocation2]  }
  0x40   : > { %p695_p7 = scmp.ne.s32.totalorder %s168_s27, %s694_s21  ;;  %s699_s22 = sshll.u32 %s783_s17, 4  ;;  %s700_s22 = int_to_ptr.vmem [resolvable:$false] %s699_s22 }
  0x41   : > { %s701_s23 = scalar_lea.vmem %s700_s22, 256  ;;  %p702_p13 = scmp.lt.s32.totalorder %s168_s27, %s700_s22 }
  0x42   : > { %p697_p9 = pnand %p695_p7, %p683_p0  ;;  %p703_p5 = scmp.lt.s32.totalorder %s701_s23, %s694_s21 }
  0x44   : > { %p698_p3 = pneg %p697_p9  ;;  %p704_p4 = por %p703_p5, %p702_p13 }
  0x46   : > { %p705_p8 = pnand %p704_p4, %p698_p3 }
  0x48   : > { %708 = shalt.err (!%p705_p8)
}
  0x49   : > { %571 = dma.hbm_to_vmem [thread:$0]  (!%p907_p11), %s905_s25, 128, %s168_s27, %s157_s29  }
  0x4a   : > { %p999_p10 = scmp.ne.s32.totalorder %s994_s20, 0 }
  0x4b   : > { %s928_s24 = sand.u32 (!%p999_p10), 1, %s769_s13   ;;  %p1000_p4 = scmp.ne.s32.totalorder (!%p999_p10), %s992_s18, 0 }
  0x4c   : > { %176 = sbr.rel (%p999_p10) target bundleno = 645 (0x285), region = 32  ;;  %s507_s26 = sshll.u32 (!%p999_p10), %s928_s24, 3 }
  0x4d   : > { %s179_s30 = scalar_lea.sflag (!%p999_p10), [#allocation3], %s928_s24  ;;  %s182_s4 = scalar_lea.vmem (!%p999_p10), [#allocation2], %s507_s26 }
  0x51   : > { %752 = dma.done.wait (%p1000_p4), %s179_s30, 128  }
  0x52   : > { %754 = vsyncadd (%p1000_p4), %s179_s30, 4294967168  ;;  %p1001_p8 = scmp.eq.s32.totalorder %s831_s16, 0 }
  0x54   : > { %756 = dma.done.wait (%p1001_p8), [#allocation6], 384   ;;  %p1002_p3 = pmov %p1001_p8 }
  0x55   : > { %vm233_vm0 = vcmask 1040384   ;;  %v784_v0 = vmov 1.0   ;;  %vm226_vm1 = vcmask 203776   ;;  %v213_v1 = vld [vmem:[%s182_s4] sm:$0xff]  ;;  %v224_v2 = vld [vmem:[#allocation5] sm:$0xff]  ;;  %s785_s20 = smov 126   ;;  %v214_v3 = vlaneseq }
  0x56   : > { %758 = vsyncadd (%p1002_p3), [#allocation6], 4294966912  ;;  %531 = vmatprep.subr.msk.mxu0 %vm233_vm0, %v784_v0  ;;  %220 = vrot.lane.b32.xlu0 %v213_v1, %s785_s20  ;;  %s786_s18 = smov 2   ;;  %v225_v7 = vld [vmem:[#allocation5 + $0x8] sm:$0xff]  ;;  %v787_v8 = vmov 0.0   ;;  %vm788_vm4 = vmmov 0  }
  0x57   : > { %532 = vmatpush3.msk.msra.mxu0 %vm233_vm0, %v784_v0  ;;  %539 = vmatprep.mubr.msk.f32.mxu0 %vm226_vm1, %v224_v2  ;;  %v215_v4 = vand.u32 127, %v214_v3  ;;  %v318_v17 = vld [vmem:[#allocation7] sm:$0xff]  ;;  %vm319_vm5 = vcmask 72704   ;;  %s519_s25 = sshll.u32 %s831_s16, 7  ;;  %s212_s27 = scalar_lea.vmem [#allocation8], %s507_s26 }
  0x58   : > { %542 = vmatprep.subr.mxu1 %v787_v8  ;;  %546 = vmatprep.mubr.msk.f32.mxu1 %vm788_vm4, %v787_v8  ;;  %s410_s28 = sshll.u32 %s212_s27, 4  ;;  %s408_s6 = scalar_lea.hbm %s987_s3, %s519_s25  ;;  %s411_s28 = int_to_ptr.vmem [resolvable:$true] %s410_s28 }
  0x59   : > { %vm222_vm2 = vcmp.lt.s32.totalorder %v215_v4, 126  ;;  %vm218_vm3 = vcmp.ge.s32.totalorder %v215_v4, 2  ;;  %543 = vmatpush3.msk.msra.mxu1 %vm233_vm0, %v784_v0  ;;  %s397_s8 = scalar_lea.sflag [#allocation4], %s928_s24  ;;  %s709_s9 = scalar_lea.vmem %s411_s28, 128 }
  0x5a   : > { %216 = vrot.lane.b32.xlu0 %v213_v1, %s786_s18  ;;  %544 = vmatprep.subr.mxu1 %v787_v8  ;;  %p710_p11 = scmp.ne.s32.totalorder %s411_s28, %s709_s9  ;;  %p1003_p0 = scmp.ne.s32.totalorder %s997_s10, 0 }
  0x5b   : > { %s789_s21 = smov [#allocation8]  }
  0x5c   : > { %p711_p1 = pnand %p710_p11, %p1003_p0  ;;  %s713_s17 = sshll.u32 %s789_s21, 4  ;;  %s714_s17 = int_to_ptr.vmem [resolvable:$false] %s713_s17 }
  0x5d   : > { %s715_s16 = scalar_lea.vmem %s714_s17, 256  ;;  %p716_p6 = scmp.lt.s32.totalorder %s411_s28, %s714_s17 }
  0x5e   : > { %p712_p2 = pneg %p711_p1  ;;  %p717_p12 = scmp.lt.s32.totalorder %s715_s16, %s709_s9 }
  0x60   : > { %p718_p7 = por %p717_p12, %p716_p6 }
  0x62   : > { %p719_p9 = pnand %p718_p7, %p712_p2 }
  0xc8   : > { %v221_v5 = vpop.permute.xlu0 %220 }
  0xc9   : > { %533 = vmatprep.subr.msk.mxu0 %vm222_vm2, %v221_v5 }
  0xca   : > { %534 = vmatpush3.msk.msra.mxu0 %vm222_vm2, %v221_v5 }
  0xcb   : > { %535 = vmatprep.subr.mxu0 %v213_v1 }
  0xcc   : > { %536 = vmatpush3.msra.mxu0 %v213_v1  ;;  %v217_v6 = vpop.permute.xlu0 %216 }
  0xcd   : > { %537 = vmatprep.subr.msk.mxu0 %vm218_vm3, %v217_v6 }
  0xce   : > { %538 = vmatpush3.msk.msra.mxu0 %vm218_vm3, %v217_v6 }
  0xcf   : > { %540 = vmatmul.mubr.msk.f32.vlgmr.msra.gmra.mxu0 %vm226_vm1, %v225_v7 }
 0x18f   : > { %v541_v9 = vpop.f32.mrf.mxu0 }
 0x190   : > { %v313_v10 = vmul.f32 0.5, %v541_v9 }
 0x191   : > { %v303_v11 = vpop.f32.mrf.mxu0 }
 0x192   : > { %623 = vtanh.f32 %v313_v10 }
 0x193   : > { %625 = vtanh.f32 %v303_v11 }
 0x19f   : > { %v624_v12 = vpop.eup %623 }
 0x1a0   : > { %v315_v13 = vadd.f32 1.0, %v624_v12  ;;  %v626_v15 = vpop.eup %625 }
 0x1a2   : > { %v316_v14 = vmul.f32 0.5, %v315_v13 }
 0x1a4   : > { %v317_v16 = vmul.f32 %v626_v15, %v316_v14 }
 0x1a6   : > { %545 = vmatpush3.msra.mxu1 %v317_v16 }
 0x1a7   : > { %547 = vmatmul.mubr.msk.f32.vlgmr.msra.gmra.mxu1 %vm319_vm5, %v318_v17 }
 0x267   : > { %v389_v18 = vpop.f32.mrf.mxu1 }
 0x268   : > { %627 = vtanh.f32 %v389_v18 }
 0x269   : > { %v548_v19 = vpop.f32.mrf.mxu1 }
 0x275   : > { %v628_v20 = vpop.eup %627 }
 0x276   : > { %v394_v21 = vadd.f32 %v628_v20, %v213_v1 }
 0x278   : > { %395 = vst [vmem:[%s212_s27] sm:$0xff] %v394_v21 }
 0x279   : > { %722 = shalt.err (!%p719_p9)
}
 0x27a   : > { %s723_s22 = scalar_lea.hbm %s408_s6, 128  ;;  %s727_s26 = scalar_lea.hbm %s987_s3, 256 }
 0x27b   : > { %p724_p13 = scmp.ne.s32.totalorder %s408_s6, %s723_s22  ;;  %p728_p4 = scmp.lt.s32.totalorder %s408_s6, %s987_s3 }
 0x27c   : > { %p729_p8 = scmp.lt.s32.totalorder %s727_s26, %s723_s22 }
 0x27d   : > { %p725_p5 = pnand %p724_p13, %p1003_p0 }
 0x27e   : > { %p730_p3 = por %p729_p8, %p728_p4 }
 0x27f   : > { %p726_p10 = pneg %p725_p5 }
 0x281   : > { %p731_p11 = pnand %p730_p3, %p726_p10 }
 0x283   : > { %734 = shalt.err (!%p731_p11)
}
 0x284   : > { %559 = dma.vmem_to_hbm [thread:$0]  (%p1003_p0), %s411_s28, 128, %s408_s6, %s397_s8  }
 0x285 PF: > { %s422_s20 = sand.u32 1, %s765_s12   ;;  %p1004_p1 = scmp.ne.s32.totalorder %s993_s19, 0 }
 0x286   : > { %p1005_p2 = scmp.ge.s32.totalorder %s777_s15, 2  ;;  %s423_s18 = scalar_lea.sflag [#allocation4], %s422_s20 }
 0x288   : > { %p573_p6 = pnand %p1005_p2, %p1004_p1 }
 0x28a   : > { %p574_p12 = pneg %p573_p6 }
 0x28c   : > { %760 = dma.done.wait (%p574_p12), %s423_s18, 128  }
 0x28d   : > { %762 = vsyncadd (%p574_p12), %s423_s18, 4294967168  ;;  %p17_p7 = scmp.ge.s32.totalorder %s882_s7, 4   ;;  %s1006_s12 = smov %s769_s13 }
 0x28e   : > { %s1007_s13 = smov %s773_s14  ;;  %s1008_s14 = smov %s898_s11 }
 0x28f   : > { %s1009_s15 = smov %s882_s7  ;;  %19 = sbr.rel (!%p17_p7) target bundleno = 6 (0x6), region = 85 }
 0x294   :  { %428 = vsyncpa [#allocation3], 1 }
 0x295   :  { %430 = vsyncpa [#allocation3 + $0x1], 1 }
 0x296   :  { %431 = vsyncpa [#allocation6], 1 }
 0x297   :  { %432 = vsyncpa [#allocation4], 1 }
 0x298   :  { %434 = vsyncpa [#allocation4 + $0x1], 1 }

</bundles_post_ra>
